<compile_context>
chip_gen: v5e
topology: v5e:2x2
jax: 0.10.0
libtpu: 0.0.40
codegen_flags: <defaults>
</compile_context>

<pallas_src>
import functools
import math

import jax
import jax.numpy as jnp
from jax import lax
from jax.experimental import pallas as pl
from jax.experimental.pallas import tpu as pltpu


# ---------------------------------------------------------------------------
# Pallas kernel: QKV projection + RoPE + causal flash attention + out proj
# (one batch element per grid step)
# ---------------------------------------------------------------------------
def _mha_kernel(x_ref, wqkv_ref, bqkv_ref, wproj_ref, bproj_ref,
                cos_ref, sin_ref, out_ref, *,
                num_heads, head_size, q_block, mm_dtype):
    H, D = num_heads, head_size
    C = H * D
    T = x_ref.shape[0]
    tq = q_block
    nq = T // tq
    f32 = jnp.float32

    # ---- QKV projection: single MXU matmul, f32 accumulation ---------------
    x = x_ref[...]                                                  # (T, C)
    qkv = jnp.dot(x, wqkv_ref[...],
                  preferred_element_type=f32) + bqkv_ref[...]       # (T, 3C) f32
    q_lin = qkv[:, 0 * C:1 * C]      # per-head half layout, pre-scaled 1/sqrt(D)
    k_lin = qkv[:, 1 * C:2 * C]      # per-head half layout
    v_lin = qkv[:, 2 * C:3 * C]      # original layout

    # ---- RoPE (rotate-half form; pure element-wise, f32) --------------------
    cos = cos_ref[...].reshape(T, 1, D)                             # (T, 1, D)
    sin = sin_ref[...].reshape(T, 1, D)                             # signed sin

    def rope(t2d):
        t3 = t2d.reshape(T, H, D)                                   # (T, H, D)
        rot = jnp.concatenate([t3[..., D // 2:], t3[..., :D // 2]], axis=-1)
        return t3 * cos + rot * sin

    q3 = rope(q_lin)                                                # (T, H, D) f32
    k3 = rope(k_lin)
    v3 = v_lin.reshape(T, H, D)

    # ---- heads to leading batch dim (single layout transform each) ----------
    qh = pltpu.einshape("thd->htd", q3).astype(mm_dtype)            # (H, T, D)
    kh = pltpu.einshape("thd->htd", k3).astype(mm_dtype)
    vh = pltpu.einshape("thd->htd", v3).astype(mm_dtype)

    # ---- causal flash attention: online softmax over KV tiles ---------------
    for qi in range(nq):
        q_t = qh[:, qi * tq:(qi + 1) * tq, :]                       # (H, tq, D)
        m = l = acc = None
        for ki in range(qi + 1):                 # causal: skip fully-masked tiles
            k_t = kh[:, ki * tq:(ki + 1) * tq, :]
            v_t = vh[:, ki * tq:(ki + 1) * tq, :]
            s = jnp.einsum('hqd,hkd->hqk', q_t, k_t,
                           preferred_element_type=f32)               # (H, tq, tq)
            if ki == qi:  # only the diagonal tile needs masking (in-kernel iota)
                rows = lax.broadcasted_iota(jnp.int32, (tq, tq), 0)
                cols = lax.broadcasted_iota(jnp.int32, (tq, tq), 1)
                s = jnp.where((rows >= cols)[None, :, :], s, -1e30)
            s_max = jnp.max(s, axis=-1, keepdims=True)
            if ki == 0:
                m_new = s_max
                p = jnp.exp(s - m_new)
                l = jnp.sum(p, axis=-1, keepdims=True)
                acc = jnp.einsum('hqk,hkd->hqd', p.astype(mm_dtype), v_t,
                                 preferred_element_type=f32)
            else:
                m_new = jnp.maximum(m, s_max)
                alpha = jnp.exp(m - m_new)
                p = jnp.exp(s - m_new)
                l = alpha * l + jnp.sum(p, axis=-1, keepdims=True)
                acc = alpha * acc + jnp.einsum('hqk,hkd->hqd',
                                               p.astype(mm_dtype), v_t,
                                               preferred_element_type=f32)
            m = m_new

        o = acc * pl.reciprocal(l, approx=True)                     # (H, tq, D) f32

        # ---- merge heads + output projection for this q tile ----------------
        y = pltpu.einshape("htd->thd", o).reshape(tq, C)            # (tq, C)
        out_t = jnp.dot(y.astype(mm_dtype), wproj_ref[...],
                        preferred_element_type=f32) + bproj_ref[...]
        out_ref[qi * tq:(qi + 1) * tq, :] = out_t.astype(out_ref.dtype)


# ---------------------------------------------------------------------------
# Wrapper: weight folding, RoPE tables, BlockSpecs / grid
# ---------------------------------------------------------------------------
def multi_head_attention(x, params, *, num_heads, head_size, rope_base=10000,
                         q_block=None, matmul_dtype=jnp.bfloat16,
                         vmem_limit_bytes=None):
    B, T, C = x.shape
    H, D = num_heads, head_size
    assert C == H * D and D % 2 == 0

    # q/kv tile length for the in-kernel flash loop (keeps scores O(H*tq*tq)).
    tq = min(T, 256) if q_block is None else q_block
    assert T % tq == 0

    f32 = jnp.float32
    scale = 1.0 / math.sqrt(D)

    # ---- fold per-head evens-then-odds permutation + score scale into W_qkv --
    w_full = params["attn_w"].T.astype(f32)                         # (C, 3C): x @ W
    b_full = params["attn_b"].astype(f32)                           # (3C,)
    wq, wk, wv = w_full[:, :C], w_full[:, C:2 * C], w_full[:, 2 * C:]
    bq, bk, bv = b_full[:C], b_full[C:2 * C], b_full[2 * C:]

    perm = []
    for h in range(H):
        base = h * D
        perm += [base + 2 * i for i in range(D // 2)]        # evens first
        perm += [base + 2 * i + 1 for i in range(D // 2)]    # then odds
    perm = jnp.asarray(perm)

    wqkv = jnp.concatenate([wq[:, perm] * scale, wk[:, perm], wv], axis=1)  # (C,3C)
    bqkv = jnp.concatenate([bq[perm] * scale, bk[perm], bv]).reshape(1, 3 * C)
    wproj = params["proj_w"].T.astype(f32)                          # (C, C)
    bproj = params["proj_b"].reshape(1, C).astype(f32)

    # ---- RoPE tables in half layout, a single (T, D) copy --------------------
    theta = 1.0 / (rope_base ** (jnp.arange(0, D, 2, dtype=f32) / D))        # (D/2,)
    ang = jnp.arange(T, dtype=f32)[:, None] * theta[None, :]                 # (T, D/2)
    cos_td = jnp.concatenate([jnp.cos(ang), jnp.cos(ang)], axis=-1)          # (T, D)
    sin_td = jnp.concatenate([-jnp.sin(ang), jnp.sin(ang)], axis=-1)         # signed

    # ---- matmul-operand dtype (bf16 on v6e/v7x; f32 accumulation in-kernel) --
    x_in = x.astype(matmul_dtype)
    wqkv = wqkv.astype(matmul_dtype)
    wproj = wproj.astype(matmul_dtype)

    kernel = functools.partial(_mha_kernel, num_heads=H, head_size=D,
                               q_block=tq, mm_dtype=matmul_dtype)

    cp_kwargs = dict(dimension_semantics=("parallel",))
    if vmem_limit_bytes is not None:
        cp_kwargs["vmem_limit_bytes"] = vmem_limit_bytes

    out = pl.pallas_call(
        kernel,
        out_shape=jax.ShapeDtypeStruct((B, T, C), f32),
        grid_spec=pltpu.PrefetchScalarGridSpec(
            num_scalar_prefetch=0,
            grid=(B,),
            in_specs=[
                pl.BlockSpec((None, T, C), lambda b: (b, 0, 0)),   # x[b]
                pl.BlockSpec((C, 3 * C), lambda b: (0, 0)),        # W_qkv (resident)
                pl.BlockSpec((1, 3 * C), lambda b: (0, 0)),        # b_qkv (f32)
                pl.BlockSpec((C, C), lambda b: (0, 0)),            # W_proj
                pl.BlockSpec((1, C), lambda b: (0, 0)),            # b_proj (f32)
                pl.BlockSpec((T, D), lambda b: (0, 0)),            # cos (half layout)
                pl.BlockSpec((T, D), lambda b: (0, 0)),            # sin (signed)
            ],
            out_specs=pl.BlockSpec((None, T, C), lambda b: (b, 0, 0)),
        ),
        compiler_params=pltpu.CompilerParams(**cp_kwargs),
    )(x_in, wqkv, bqkv, wproj, bproj, cos_td, sin_td)
    return out


# ---------------------------------------------------------------------------
# Pure-JAX reference (mirrors the PyTorch module math)
# ---------------------------------------------------------------------------
def reference_mha(x, params, *, num_heads, head_size, rope_base=10000):
    B, T, C = x.shape
    D, H = head_size, num_heads

    qkv = x @ params["attn_w"].T + params["attn_b"]
    q, k, v = jnp.split(qkv, 3, axis=2)
    q = q.reshape(B, T, H, D)
    k = k.reshape(B, T, H, D)
    v = v.reshape(B, T, H, D)

    theta = 1.0 / (rope_base ** (jnp.arange(0, D, 2, dtype=jnp.float32) / D))
    idx_theta = jnp.arange(T, dtype=jnp.float32)[:, None] * theta[None, :]
    cos = jnp.cos(idx_theta)[None, :, None, :]
    sin = jnp.sin(idx_theta)[None, :, None, :]

    def rope(t):
        ts = t.reshape(B, T, H, D // 2, 2)
        t0, t1 = ts[..., 0], ts[..., 1]
        out = jnp.stack([t0 * cos - t1 * sin, t1 * cos + t0 * sin], axis=-1)
        return out.reshape(B, T, H, D)

    q = rope(q)
    k = rope(k)

    q = q.transpose(0, 2, 1, 3)
    k = k.transpose(0, 2, 1, 3)
    v = v.transpose(0, 2, 1, 3)

    s = jnp.einsum("bhqd,bhkd->bhqk", q, k) / math.sqrt(D)
    mask = jnp.tril(jnp.ones((T, T), dtype=bool))
    s = jnp.where(mask[None, None], s, -jnp.inf)
    p = jax.nn.softmax(s, axis=-1)
    o = jnp.einsum("bhqk,bhkd->bhqd", p, v)
    o = o.transpose(0, 2, 1, 3).reshape(B, T, C)
    return o @ params["proj_w"].T + params["proj_b"]


# ---------------------------------------------------------------------------
if __name__ == "__main__":
    # config: embedding_dim=32, num_heads=4 -> head_size=8, seq T=8, batch B=2
    B, T, C, H = 2, 8, 32, 4
    D = C // H

    key = jax.random.PRNGKey(0)
    k_x, k_w1, k_b1, k_w2, k_b2 = jax.random.split(key, 5)

    bound = 1.0 / math.sqrt(C)
    params = {
        "attn_w": jax.random.uniform(k_w1, (3 * C, C), jnp.float32, -bound, bound),
        "attn_b": jax.random.uniform(k_b1, (3 * C,), jnp.float32, -bound, bound),
        "proj_w": jax.random.uniform(k_w2, (C, C), jnp.float32, -bound, bound),
        "proj_b": jax.random.uniform(k_b2, (C,), jnp.float32, -bound, bound),
    }
    x = jax.random.normal(k_x, (B, T, C), jnp.float32)

    ref = reference_mha(x, params, num_heads=H, head_size=D)

    # f32 matmul operands (v5e-friendly path); tolerance accounts only for the
    # approx EUP reciprocal in the softmax normalization.
    out_f32 = multi_head_attention(x, params, num_heads=H, head_size=D,
                                   matmul_dtype=jnp.float32)
    out_f32 = jax.block_until_ready(out_f32)
    assert out_f32.shape == (B, T, C)
    err_f32 = float(jnp.max(jnp.abs(out_f32 - ref)))
    assert jnp.allclose(out_f32, ref, atol=5e-3, rtol=5e-3), err_f32

    # bf16 matmul operands + f32 accumulation (default, v6e/v7x path); softmax
    # and RoPE remain f32, tolerance loosened for bf16 operand rounding.
    out_bf16 = multi_head_attention(x, params, num_heads=H, head_size=D,
                                    matmul_dtype=jnp.bfloat16)
    out_bf16 = jax.block_until_ready(out_bf16)
    err_bf16 = float(jnp.max(jnp.abs(out_bf16 - ref)))
    assert jnp.allclose(out_bf16, ref, atol=4e-2, rtol=4e-2), err_bf16

    print("KERNEL_OK")
</pallas_src>

<mosaic_0001>
module attributes {stable_mosaic.version = 11 : i64} {
  func.func @_mha_kernel(%arg0: i32, %arg1: memref<1x8x32xf32, #tpu.memory_space<vmem>>, %arg2: memref<32x96xf32, #tpu.memory_space<vmem>>, %arg3: memref<1x96xf32, #tpu.memory_space<vmem>>, %arg4: memref<32x32xf32, #tpu.memory_space<vmem>>, %arg5: memref<1x32xf32, #tpu.memory_space<vmem>>, %arg6: memref<8x8xf32, #tpu.memory_space<vmem>>, %arg7: memref<8x8xf32, #tpu.memory_space<vmem>>, %arg8: memref<1x8x32xf32, #tpu.memory_space<vmem>>) attributes {dimension_semantics = [#tpu.dimension_semantics<parallel>], iteration_bounds = array<i64: 2>, scalar_prefetch = 0 : i64, scratch_operands = 0 : i64, tpu.core_type = #tpu.core_type<tc>, window_params = [{transform_indices = @transform_0, window_bounds = array<i64: 1, 8, 32>}, {pipeline_mode = #tpu.pipeline_mode<synchronous>, transform_indices = @transform_1, window_bounds = array<i64: 32, 96>}, {pipeline_mode = #tpu.pipeline_mode<synchronous>, transform_indices = @transform_2, window_bounds = array<i64: 1, 96>}, {pipeline_mode = #tpu.pipeline_mode<synchronous>, transform_indices = @transform_3, window_bounds = array<i64: 32, 32>}, {pipeline_mode = #tpu.pipeline_mode<synchronous>, transform_indices = @transform_4, window_bounds = array<i64: 1, 32>}, {pipeline_mode = #tpu.pipeline_mode<synchronous>, transform_indices = @transform_5, window_bounds = array<i64: 8, 8>}, {pipeline_mode = #tpu.pipeline_mode<synchronous>, transform_indices = @transform_6, window_bounds = array<i64: 8, 8>}, {transform_indices = @transform_7, window_bounds = array<i64: 1, 8, 32>}]} {
    %c0 = arith.constant 0 : index
    %c0_0 = arith.constant 0 : index
    %c0_1 = arith.constant 0 : index
    %0 = vector.load %arg1[%c0, %c0_0, %c0_1] : memref<1x8x32xf32, #tpu.memory_space<vmem>>, vector<1x8x32xf32>
    %1 = vector.shape_cast %0 : vector<1x8x32xf32> to vector<8x32xf32>
    %c0_2 = arith.constant 0 : index
    %c0_3 = arith.constant 0 : index
    %2 = vector.load %arg2[%c0_2, %c0_3] : memref<32x96xf32, #tpu.memory_space<vmem>>, vector<32x96xf32>
    %cst = arith.constant dense<0.000000e+00> : vector<8x96xf32>
    %3 = tpu.matmul %1, %2, %cst {dimension_numbers = #tpu.dot_dimension_numbers<[1], [0], [0], [1], [0, 0, 1, 1], [], []>} : vector<8x32xf32>, vector<32x96xf32>, vector<8x96xf32> -> vector<8x96xf32>
    %c0_4 = arith.constant 0 : index
    %c0_5 = arith.constant 0 : index
    %4 = vector.load %arg3[%c0_4, %c0_5] : memref<1x96xf32, #tpu.memory_space<vmem>>, vector<1x96xf32>
    %5 = vector.broadcast %4 : vector<1x96xf32> to vector<8x96xf32>
    %6 = arith.addf %3, %5 : vector<8x96xf32>
    %7 = vector.extract_strided_slice %6 {offsets = [0, 0], sizes = [8, 32], strides = [1, 1]} : vector<8x96xf32> to vector<8x32xf32>
    %8 = vector.extract_strided_slice %6 {offsets = [0, 32], sizes = [8, 32], strides = [1, 1]} : vector<8x96xf32> to vector<8x32xf32>
    %9 = vector.extract_strided_slice %6 {offsets = [0, 64], sizes = [8, 32], strides = [1, 1]} : vector<8x96xf32> to vector<8x32xf32>
    %c0_6 = arith.constant 0 : index
    %c0_7 = arith.constant 0 : index
    %10 = vector.load %arg6[%c0_6, %c0_7] : memref<8x8xf32, #tpu.memory_space<vmem>>, vector<8x8xf32>
    %11 = vector.shape_cast %10 : vector<8x8xf32> to vector<8x1x8xf32>
    %c0_8 = arith.constant 0 : index
    %c0_9 = arith.constant 0 : index
    %12 = vector.load %arg7[%c0_8, %c0_9] : memref<8x8xf32, #tpu.memory_space<vmem>>, vector<8x8xf32>
    %13 = vector.shape_cast %12 : vector<8x8xf32> to vector<8x1x8xf32>
    %14 = vector.shape_cast %7 : vector<8x32xf32> to vector<8x4x8xf32>
    %15 = vector.extract_strided_slice %14 {offsets = [0, 0, 4], sizes = [8, 4, 4], strides = [1, 1, 1]} : vector<8x4x8xf32> to vector<8x4x4xf32>
    %16 = vector.extract_strided_slice %14 {offsets = [0, 0, 0], sizes = [8, 4, 4], strides = [1, 1, 1]} : vector<8x4x8xf32> to vector<8x4x4xf32>
    %17 = tpu.concatenate %15, %16 in 2 : vector<8x4x4xf32>, vector<8x4x4xf32> -> vector<8x4x8xf32>
    %18 = vector.broadcast %11 : vector<8x1x8xf32> to vector<8x4x8xf32>
    %19 = arith.mulf %14, %18 : vector<8x4x8xf32>
    %20 = vector.broadcast %13 : vector<8x1x8xf32> to vector<8x4x8xf32>
    %21 = arith.mulf %17, %20 : vector<8x4x8xf32>
    %22 = arith.addf %19, %21 : vector<8x4x8xf32>
    %23 = vector.shape_cast %8 : vector<8x32xf32> to vector<8x4x8xf32>
    %24 = vector.extract_strided_slice %23 {offsets = [0, 0, 4], sizes = [8, 4, 4], strides = [1, 1, 1]} : vector<8x4x8xf32> to vector<8x4x4xf32>
    %25 = vector.extract_strided_slice %23 {offsets = [0, 0, 0], sizes = [8, 4, 4], strides = [1, 1, 1]} : vector<8x4x8xf32> to vector<8x4x4xf32>
    %26 = tpu.concatenate %24, %25 in 2 : vector<8x4x4xf32>, vector<8x4x4xf32> -> vector<8x4x8xf32>
    %27 = vector.broadcast %11 : vector<8x1x8xf32> to vector<8x4x8xf32>
    %28 = arith.mulf %23, %27 : vector<8x4x8xf32>
    %29 = vector.broadcast %13 : vector<8x1x8xf32> to vector<8x4x8xf32>
    %30 = arith.mulf %26, %29 : vector<8x4x8xf32>
    %31 = arith.addf %28, %30 : vector<8x4x8xf32>
    %32 = vector.shape_cast %9 : vector<8x32xf32> to vector<8x4x8xf32>
    %33 = tpu.transpose %22, [1, 0, 2] : vector<8x4x8xf32> -> vector<4x8x8xf32>
    %34 = tpu.transpose %31, [1, 0, 2] : vector<8x4x8xf32> -> vector<4x8x8xf32>
    %35 = tpu.transpose %32, [1, 0, 2] : vector<8x4x8xf32> -> vector<4x8x8xf32>
    "tpu.trace_start"() <{level = 10 : i32, message = "hqd,hkd->hqk"}> : () -> ()
    %cst_10 = arith.constant dense<0.000000e+00> : vector<4x8x8xf32>
    %36 = tpu.matmul %33, %34, %cst_10 {dimension_numbers = #tpu.dot_dimension_numbers<[2], [2], [1], [1], [0, 0, 0, 1, 1, 1], [0], [0]>} : vector<4x8x8xf32>, vector<4x8x8xf32>, vector<4x8x8xf32> -> vector<4x8x8xf32>
    "tpu.trace_stop"() : () -> ()
    %37 = tpu.iota {dimensions = array<i32: 0>} : vector<8x8xi32>
    %38 = tpu.iota {dimensions = array<i32: 1>} : vector<8x8xi32>
    %39 = arith.cmpi sge, %37, %38 : vector<8x8xi32>
    %40 = vector.shape_cast %39 : vector<8x8xi1> to vector<1x8x8xi1>
    %cst_11 = arith.constant -1.000000e+30 : f32
    %41 = vector.shape_cast %40 : vector<1x8x8xi1> to vector<1x8x8xi1>
    %42 = vector.broadcast %41 : vector<1x8x8xi1> to vector<4x8x8xi1>
    %43 = vector.broadcast %cst_11 : f32 to vector<4x8x8xf32>
    %44 = arith.select %42, %36, %43 : vector<4x8x8xi1>, vector<4x8x8xf32>
    %cst_12 = arith.constant dense<0xFF800000> : vector<4x8xf32>
    %45 = vector.multi_reduction <maximumf>, %44, %cst_12 [2] : vector<4x8x8xf32> to vector<4x8xf32>
    %46 = vector.shape_cast %45 : vector<4x8xf32> to vector<4x8x1xf32>
    %47 = vector.broadcast %46 : vector<4x8x1xf32> to vector<4x8x8xf32>
    %48 = arith.subf %44, %47 : vector<4x8x8xf32>
    %49 = math.exp %48 : vector<4x8x8xf32>
    %cst_13 = arith.constant dense<0.000000e+00> : vector<4x8xf32>
    %50 = vector.multi_reduction <add>, %49, %cst_13 [2] : vector<4x8x8xf32> to vector<4x8xf32>
    %51 = vector.shape_cast %50 : vector<4x8xf32> to vector<4x8x1xf32>
    "tpu.trace_start"() <{level = 10 : i32, message = "hqk,hkd->hqd"}> : () -> ()
    %cst_14 = arith.constant dense<0.000000e+00> : vector<4x8x8xf32>
    %52 = tpu.matmul %49, %35, %cst_14 {dimension_numbers = #tpu.dot_dimension_numbers<[2], [1], [1], [2], [0, 0, 0, 1, 1, 2], [0], [0]>} : vector<4x8x8xf32>, vector<4x8x8xf32>, vector<4x8x8xf32> -> vector<4x8x8xf32>
    "tpu.trace_stop"() : () -> ()
    %53 = tpu.reciprocal %51 {approx = true} : vector<4x8x1xf32> -> vector<4x8x1xf32>
    %54 = vector.broadcast %53 : vector<4x8x1xf32> to vector<4x8x8xf32>
    %55 = arith.mulf %52, %54 : vector<4x8x8xf32>
    %56 = tpu.transpose %55, [1, 0, 2] : vector<4x8x8xf32> -> vector<8x4x8xf32>
    %57 = vector.shape_cast %56 : vector<8x4x8xf32> to vector<8x32xf32>
    %c0_15 = arith.constant 0 : index
    %c0_16 = arith.constant 0 : index
    %58 = vector.load %arg4[%c0_15, %c0_16] : memref<32x32xf32, #tpu.memory_space<vmem>>, vector<32x32xf32>
    %cst_17 = arith.constant dense<0.000000e+00> : vector<8x32xf32>
    %59 = tpu.matmul %57, %58, %cst_17 {dimension_numbers = #tpu.dot_dimension_numbers<[1], [0], [0], [1], [0, 0, 1, 1], [], []>} : vector<8x32xf32>, vector<32x32xf32>, vector<8x32xf32> -> vector<8x32xf32>
    %c0_18 = arith.constant 0 : index
    %c0_19 = arith.constant 0 : index
    %60 = vector.load %arg5[%c0_18, %c0_19] : memref<1x32xf32, #tpu.memory_space<vmem>>, vector<1x32xf32>
    %61 = vector.broadcast %60 : vector<1x32xf32> to vector<8x32xf32>
    %62 = arith.addf %59, %61 : vector<8x32xf32>
    %c0_20 = arith.constant 0 : index
    %c0_21 = arith.constant 0 : index
    %c0_22 = arith.constant 0 : index
    %63 = vector.load %arg8[%c0_20, %c0_21, %c0_22] : memref<1x8x32xf32, #tpu.memory_space<vmem>>, vector<1x8x32xf32>
    %64 = vector.shape_cast %63 : vector<1x8x32xf32> to vector<8x32xf32>
    %65 = vector.shape_cast %62 : vector<8x32xf32> to vector<1x8x32xf32>
    tpu.vector_store %arg8[%c0_20, %c0_21, %c0_22], %65 {strides = array<i32>} : memref<1x8x32xf32, #tpu.memory_space<vmem>>, vector<1x8x32xf32>,
    return
  }
  func.func @transform_0(%arg0: i32) -> (i32, i32, i32) {
    %c0_i32 = arith.constant 0 : i32
    %c0_i32_0 = arith.constant 0 : i32
    %c0_i32_1 = arith.constant 0 : i32
    return %arg0, %c0_i32, %c0_i32_0 : i32, i32, i32
  }
  func.func @transform_1(%arg0: i32) -> (i32, i32) {
    %c0_i32 = arith.constant 0 : i32
    %c0_i32_0 = arith.constant 0 : i32
    %c0_i32_1 = arith.constant 0 : i32
    return %c0_i32, %c0_i32_0 : i32, i32
  }
  func.func @transform_2(%arg0: i32) -> (i32, i32) {
    %c0_i32 = arith.constant 0 : i32
    %c0_i32_0 = arith.constant 0 : i32
    %c0_i32_1 = arith.constant 0 : i32
    return %c0_i32, %c0_i32_0 : i32, i32
  }
  func.func @transform_3(%arg0: i32) -> (i32, i32) {
    %c0_i32 = arith.constant 0 : i32
    %c0_i32_0 = arith.constant 0 : i32
    %c0_i32_1 = arith.constant 0 : i32
    return %c0_i32, %c0_i32_0 : i32, i32
  }
  func.func @transform_4(%arg0: i32) -> (i32, i32) {
    %c0_i32 = arith.constant 0 : i32
    %c0_i32_0 = arith.constant 0 : i32
    %c0_i32_1 = arith.constant 0 : i32
    return %c0_i32, %c0_i32_0 : i32, i32
  }
  func.func @transform_5(%arg0: i32) -> (i32, i32) {
    %c0_i32 = arith.constant 0 : i32
    %c0_i32_0 = arith.constant 0 : i32
    %c0_i32_1 = arith.constant 0 : i32
    return %c0_i32, %c0_i32_0 : i32, i32
  }
  func.func @transform_6(%arg0: i32) -> (i32, i32) {
    %c0_i32 = arith.constant 0 : i32
    %c0_i32_0 = arith.constant 0 : i32
    %c0_i32_1 = arith.constant 0 : i32
    return %c0_i32, %c0_i32_0 : i32, i32
  }
  func.func @transform_7(%arg0: i32) -> (i32, i32, i32) {
    %c0_i32 = arith.constant 0 : i32
    %c0_i32_0 = arith.constant 0 : i32
    %c0_i32_1 = arith.constant 0 : i32
    return %arg0, %c0_i32, %c0_i32_0 : i32, i32, i32
  }
}

</mosaic_0001>

<bundles_post_ra>
// kernel: tpu_custom_call.1
= control target key start
LH: loop header
LB: loop body
LE: loop exit
PB: predicated region body
PF: predicated region fallthrough
CT: control target
= control target key end

     0   :  { %s2583_s0 = inlined_call_operand.hbm [shape: f32[2,8,32], index: 0, kind: input, shape index: {}]   ;;  %s2584_s1 = inlined_call_operand.hbm [shape: f32[32,96], index: 1, kind: input, shape index: {}]   ;;  %s2585_s2 = inlined_call_operand.vmem [shape: f32[1,96], index: 2, kind: input, shape index: {}]   ;;  %s2586_s3 = inlined_call_operand.hbm [shape: f32[32,32], index: 3, kind: input, shape index: {}]   ;;  %s2587_s4 = inlined_call_operand.vmem [shape: f32[1,32], index: 4, kind: input, shape index: {}]   ;;  %s2588_s5 = inlined_call_operand.hbm [shape: f32[8,8], index: 5, kind: input, shape index: {}]   ;;  %s2589_s6 = inlined_call_operand.hbm [shape: f32[8,8], index: 6, kind: input, shape index: {}]   ;;  %s2590_s7 = inlined_call_operand.hbm [shape: f32[2,8,32], index: 7, kind: output, shape index: {}]  }
   0x1   :  { %2591 = sst [smem:[#allocation16_spill]] %s2584_s1 }
   0x2   :  { %2592 = sst [smem:[#allocation17_spill]] %s2586_s3 }
   0x3   :  { %12 = vsyncpa [#allocation3], 0 }
   0x4   :  { %14 = vsyncpa [#allocation3 + $0x1], 0 }
   0x5   :  { %15 = vsyncpa [#allocation6], 0 }
   0x6   :  { %16 = vsyncpa [#allocation9], 0 }
   0x7   :  { %17 = vsyncpa [#allocation4], 0 }
   0x8   :  { %19 = vsyncpa [#allocation4 + $0x1], 0  ;;  %s1969_s24 = smov 0   ;;  %s1971_s25 = smov 0  }
   0x9   :  { %s1973_s26 = smov 0   ;;  %s1975_s27 = smov 0  }
   0xa LB: > { %s2593_s1 = sld [smem:[#allocation16_spill]]  ;;  %s1993_s8 = sadd.s32 4294967295, %s1909_s27   ;;  %s1909_s27 = sphi %s1975_s27, %s2606_s27   ;;  %s1905_s26 = sphi %s1973_s26, %s2605_s26   ;;  %s1901_s25 = sphi %s1971_s25, %s2604_s25   ;;  %s1897_s24 = sphi %s1969_s24, %s2603_s24  }
   0xb   : > { %p1523_p0 = scmp.ge.s32.totalorder %s1909_s27, 1  ;;  %p46_p1 = scmp.eq.s32.totalorder %s1993_s8, 0 }
   0xc   : > { %p208_p2 = scmp.lt.s32.totalorder %s1909_s27, 3  ;;  %s1911_s10 = smov [#allocation5]  }
   0xd   : > { %s221_s11 = sshll.u32 %s1911_s10, 4  ;;  %s254_s14 = sshll.u32 %s2588_s5, 4  ;;  %s222_s11 = int_to_ptr.vmem [resolvable:$true] %s221_s11  ;;  %s255_s14 = int_to_ptr.hbm [resolvable:$true] %s254_s14 }
   0xe   : > { %p1998_p3 = pnand %p1523_p0, %p208_p2  ;;  %s2596_s3 = sld [smem:[#allocation17_spill]] }
   0xf   : > { %s1912_s19 = smov [#allocation8]   ;;  %s1913_s21 = smov 128  }
  0x10   : > { %s219_s30 = sshll.u32 %s2593_s1, 4  ;;  %p1576_p4 = pneg %p1998_p3  ;;  %s220_s30 = int_to_ptr.hbm [resolvable:$true] %s219_s30 }
  0x11   : > { %s256_s20 = sshll.u32 %s1912_s19, 4  ;;  %s1914_s22 = smov 8   ;;  %s257_s20 = int_to_ptr.vmem [resolvable:$true] %s256_s20 }
  0x12   : > { %p2010_p6 = pnand %p1576_p4, %p46_p1  ;;  %s266_s29 = sshll.u32 %s2589_s6, 4  ;;  %s267_s29 = int_to_ptr.hbm [resolvable:$true] %s266_s29 }
  0x13   : > { %s1915_s10 = smov [#allocation7]   ;;  %s1522_s13 = sadd.s32 4294967294, %s1909_s27  }
  0x14   : > { %s236_s18 = sshll.u32 %s2596_s3, 4  ;;  %s238_s12 = sshll.u32 %s1915_s10, 4  ;;  %s237_s18 = int_to_ptr.hbm [resolvable:$true] %s236_s18  ;;  %s239_s12 = int_to_ptr.vmem [resolvable:$true] %s238_s12 }
  0x15   : > { %1579 = dma.hbm_to_vmem [thread:$0]  (!%p2010_p6), %s220_s30, 512, %s222_s11, [#allocation6], %s1913_s21, %s1913_s21, %s1914_s22  }
  0x16   : > { %1585 = dma.hbm_to_vmem [thread:$0]  (!%p2010_p6), %s255_s14, 128, %s257_s20, [#allocation9]  }
  0x17   : > { %1582 = dma.hbm_to_vmem [thread:$0]  (!%p2010_p6), %s237_s18, 512, %s239_s12, [#allocation6], %s1913_s21, %s1913_s21, %s1914_s22  }
  0x18   : > { %s1916_s30 = smov [#allocation10]   ;;  %s2030_s14 = sadd.s32 1, %s1909_s27  }
  0x19   : > { %s268_s11 = sshll.u32 %s1916_s30, 4  ;;  %s29_s16 = ssub.s32 %s1909_s27, %s2030_s14  ;;  %s269_s11 = int_to_ptr.vmem [resolvable:$true] %s268_s11 }
  0x1a   : > { %1588 = dma.hbm_to_vmem [thread:$0]  (!%p2010_p6), %s267_s29, 128, %s269_s11, [#allocation9]  }
  0x1b   : > { %s32_s17 = sadd.s32 1, %s1905_s26  ;;  %p30_p7 = scmp.eq.s32.totalorder %s29_s16, 0 }
  0x1c   : > { %p39_p8 = scmp.ne.s32.totalorder %s1905_s26, %s1901_s25  ;;  %p40_p9 = scmp.eq.s32.totalorder %s1909_s27, 0 }
  0x1d   : > { %p45_p10 = scmp.ne.s32.totalorder %s1901_s25, %s1897_s24  ;;  %p195_p13 = scmp.eq.s32.totalorder %s1993_s8, 1 }
  0x1e   : > { %s2041_s18 = scalar_select %p30_p7, %s1905_s26, %s32_s17  }
  0x1f   : > { %p2043_p11 = por %p40_p9, %p39_p8  ;;  %p2049_p12 = por %p46_p1, %p45_p10 }
  0x20   : > { %p201_p0 = scmp.eq.s32.totalorder %s1522_s13, 1  ;;  %p1601_p2 = scmp.lt.s32.totalorder %s1909_s27, 2 }
  0x21   : > { %s279_s20 = sand.u32 1, %s1905_s26   ;;  %p2056_p4 = por %p195_p13, %p39_p8 }
  0x22   : > { %p2060_p6 = por %p201_p0, %p45_p10  ;;  %s1529_s23 = sshll.u32 %s279_s20, 3 }
  0x23   : > { %s1530_s28 = sshll.u32 %s1909_s27, 3  ;;  %s283_s30 = scalar_lea.vmem [#allocation2], %s1529_s23 }
  0x24   : > { %s287_s12 = scalar_lea.hbm %s2583_s0, %s1530_s28  ;;  %s291_s11 = sshll.u32 %s283_s30, 4  ;;  %s292_s11 = int_to_ptr.vmem [resolvable:$true] %s291_s11 }
  0x25   : > { %s289_s16 = sshll.u32 %s287_s12, 4  ;;  %p2070_p7 = pnand %p1601_p2, %p2043_p11  ;;  %s290_s16 = int_to_ptr.hbm [resolvable:$true] %s289_s16 }
  0x26   : > { %s280_s17 = scalar_lea.sflag [#allocation3], %s279_s20  ;;  %s1805_s1 = sshra.s32 %s290_s16, 4  ;;  %s1806_s1 = int_to_ptr.hbm [resolvable:$true] %s1805_s1 }
  0x27   : > { %s1807_s3 = scalar_lea.hbm %s1806_s1, 8  ;;  %p1809_p9 = pneg %p2070_p7 }
  0x28   : > { %p1808_p8 = scmp.ne.s32.totalorder %s1806_s1, %s1807_s3  ;;  %s1812_s29 = scalar_lea.hbm %s2583_s0, 16 }
  0x29   : > { %p1813_p11 = scmp.lt.s32.totalorder %s1806_s1, %s2583_s0  ;;  %p1814_p0 = scmp.lt.s32.totalorder %s1812_s29, %s1807_s3 }
  0x2a   : > { %p1810_p10 = pnand %p1809_p9, %p1808_p8 }
  0x2b   : > { %p1815_p2 = por %p1814_p0, %p1813_p11 }
  0x2c   : > { %p1811_p13 = pneg %p1810_p10 }
  0x2e   : > { %p1816_p5 = pnand %p1815_p2, %p1811_p13 }
  0x30   : > { %1819 = shalt.err (!%p1816_p5)
}
  0x31   : > { %1592 = dma.hbm_to_vmem [thread:$0]  (!%p2070_p7), %s290_s16, 128, %s292_s11, %s280_s17  }
  0x32   : > { %300 = sbr.rel (%p1998_p3) target bundleno = 1289 (0x509), region = 48  ;;  %s2087_s20 = sand.u32 (!%p1998_p3), 1, %s1901_s25  }
  0x33   : > { %s1532_s12 = sshll.u32 (!%p1998_p3), %s2087_s20, 3  ;;  %s303_s30 = scalar_lea.sflag (!%p1998_p3), [#allocation3], %s2087_s20 }
  0x34   : > { %s306_s1 = scalar_lea.vmem (!%p1998_p3), [#allocation2], %s1532_s12 }
  0x37   : > { %1880 = dma.done.wait (%p2049_p12), %s303_s30, 128  }
  0x38   : > { %1882 = vsyncadd (%p2049_p12), %s303_s30, 4294967168 }
  0x39   : > { %1884 = dma.done.wait (%p46_p1), [#allocation6], 1024  }
  0x3a   : > { %1886 = vsyncadd (%p46_p1), [#allocation6], 4294966272 }
  0x3b   : > { %1888 = dma.done.wait (%p46_p1), [#allocation9], 256  }
  0x3c   : > { %1890 = vsyncadd (%p46_p1), [#allocation9], 4294967040  ;;  %v362_v0 = vld [vmem:[#allocation5 + $0x18] sm:$0xff]  ;;  %v361_v1 = vld [vmem:[#allocation5 + $0x10] sm:$0xff]  ;;  %vm367_vm0 = vcmask 261120   ;;  %s1917_s15 = smov 96  }
  0x3d   : > { %383 = vmatpush.msra.mxu0 %v362_v0  ;;  %v360_v2 = vld [vmem:[#allocation5 + $0x8] sm:$0xff]  ;;  %v359_v3 = vld [vmem:[#allocation5] sm:$0xff]  ;;  %v358_v4 = vld [vmem:[%s306_s1] sm:$0xff]  ;;  %s1918_s11 = smov 120   ;;  %s1919_s16 = smov 112   ;;  %vm420_vm1 = vcmask 1047556  }
  0x3e   : > { %v1667_v5 = vld [vmem:[%s2585_s2] ss:$0 sm:$0xff]  ;;  %s1920_s13 = smov 104   ;;  %v1921_v8 = vmov 1983009808   ;;  %s1923_s17 = smov 4  }
  0x3f   : > { %384 = vmatpush.msra.mxu0 %v361_v1  ;;  %v425_v9 = vunpack.c.l.s4 %v1921_v8  ;;  %v1922_v17 = vmov 1934713408   ;;  %s1924_s23 = smov 124   ;;  %v2208_v63 = vld [vmem:[#allocation8] sm:$0xff]  ;;  %vm532_vm2 = vcmask 31744   ;;  %s1925_s28 = smov 64  }
  0x40   : > { %v449_v18 = vunpack.c.l.s4 %v1922_v17  ;;  %vm987_vm3 = vcmask 64512   ;;  %s1926_s29 = smov 24   ;;  %s1927_s10 = smov 16   ;;  %vm1362_vm5 = vcmask 130048   ;;  %vm1364_vm6 = vcmask 195584  }
  0x41   : > { %385 = vmatpush.msra.mxu0 %v360_v2  ;;  %v2123_v14 = vunpack.c.0.s8 %v425_v9  ;;  %v398_v9 = vrot.slane %v2208_v63, 6  ;;  %s1928_s19 = smov 8   ;;  %s1553_s30 = sshll.u32 %s1993_s8, 3 }
  0x42   : > { %v2138_v25 = vunpack.c.0.s8 %v449_v18  ;;  %s1409_s9 = scalar_lea.hbm %s2590_s7, %s1553_s30  ;;  %s1399_s8 = scalar_lea.sflag [#allocation4], %s2087_s20 }
  0x43   : > { %386 = vmatpush.msra.mxu0 %v359_v3  ;;  %v2212_v3 = vld [vmem:[#allocation10] sm:$0xff]  ;;  %v2230_v17 = vperm.slane %v398_v9, 0 }
  0x44   : > { %1538 = vmatmul.msk.f32.vlgmr.msra.gmra.mxu0 %vm367_vm0, %v358_v4 }
  0xc1   : > { %v388_v6 = vpop.f32.mrf.mxu0 }
  0xc2   : > { %v2109_v7 = vadd.f32 %v1667_v5, %v388_v6 }
  0xc4   : > { %597 = vrot.lane.b32.xlu2 %v2109_v7, %s1917_s15  ;;  %410 = vrot.lane.b32.xlu1 %v2109_v7, %s1918_s11  ;;  %v422_v13 = vrot.slane %v2109_v7, 4 }
  0xc5   : > { %413 = vrot.lane.b32.xlu0 %v2109_v7, %s1919_s16  ;;  %s357_s16 = scalar_lea.vmem [#allocation11], %s1532_s12  ;;  %s1855_s12 = scalar_lea.hbm %s2590_s7, 16 }
  0xcd   : > { %416 = vrot.lane.b32.xlu0 %v2109_v7, %s1920_s13  ;;  %s1411_s13 = sshll.u32 %s357_s16, 4  ;;  %s1412_s13 = int_to_ptr.vmem [resolvable:$true] %s1411_s13 }
 0x11e   : > { %v598_v49 = vpop.permute.xlu2 %597 }
 0x11f   : > { %v611_v51 = vrot.slane %v598_v49, 4 }
 0x136   : > { %v2115_v10 = vpop.permute.xlu1 %410 }
 0x137   : > { %v2117_v11 = vpop.permute.xlu0 %413  ;;  %599 = vrot.lane.b32.xlu0 %v2115_v10, %s1917_s15  ;;  %v434_v20 = vrot.slane %v2115_v10, 4 }
 0x138   : > { %v419_v12 = vrot.slane %v2117_v11, 4  ;;  %601 = vrot.lane.b32.xlu1 %v2117_v11, %s1917_s15  ;;  %v423_v15 = vsel %vm420_vm1, %v2117_v11, %v422_v13  ;;  %v407_v13 = vrot.slane %v2212_v3, 6 }
 0x139   : > { %v431_v19 = vperm.slane %v423_v15, %v2123_v14 }
 0x13a   : > { %v421_v16 = vsel %vm420_vm1, %v419_v12, %v2109_v7  ;;  %v2232_v18 = vperm.slane %v407_v13, 0 }
 0x13b   : > { %v427_v21 = vperm.slane %v421_v16, %v2123_v14  ;;  %v458_v26 = vrot.slane %v431_v19, 4 }
 0x13d   : > { %v446_v31 = vrot.slane %v427_v21, 4 }
 0x13f   : > { %v2132_v22 = vpop.permute.xlu0 %416 }
 0x140   : > { %v432_v23 = vrot.slane %v2132_v22, 4  ;;  %v435_v24 = vsel %vm420_vm1, %v2132_v22, %v434_v20  ;;  %603 = vrot.lane.b32.xlu2 %v2132_v22, %s1917_s15 }
 0x141   : > { %v443_v27 = vperm.slane %v435_v24, %v2123_v14 }
 0x142   : > { %v433_v28 = vsel %vm420_vm1, %v432_v23, %v2115_v10 }
 0x143   : > { %v439_v29 = vperm.slane %v433_v28, %v2123_v14  ;;  %v459_v30 = vsel %vm420_vm1, %v443_v27, %v458_v26  ;;  %v456_v33 = vrot.slane %v443_v27, 4  ;;  %v394_v27 = vrot.slane %v2208_v63, 2 }
 0x144   : > { %v2146_v32 = vperm.slane %v459_v30, %v2138_v25  ;;  %v403_v28 = vrot.slane %v2212_v3, 2 }
 0x145   : > { %v447_v34 = vsel %vm420_vm1, %v439_v29, %v446_v31  ;;  %v457_v36 = vsel %vm420_vm1, %v456_v33, %v431_v19  ;;  %v444_v39 = vrot.slane %v439_v29, 4 }
 0x146   : > { %520 = vrot.lane.b32.xlu1 %v2146_v32, %s1923_s17  ;;  %496 = vrot.lane.b32.xlu0 %v2146_v32, %s1924_s23  ;;  %v2154_v35 = vperm.slane %v447_v34, %v2138_v25  ;;  %v474_v37 = vrot.slane %v2146_v32, 4  ;;  %v2161_v38 = vperm.slane %v457_v36, %v2138_v25  ;;  %v563_v26 = vmul.f32 %v2230_v17, %v2146_v32 }
 0x147   : > { %v445_v41 = vsel %vm420_vm1, %v444_v39, %v427_v21  ;;  %v2256_v36 = vperm.slane %v394_v27, 0 }
 0x148   : > { %488 = vrot.lane.b32.xlu2 %v2154_v35, %s1924_s23  ;;  %v2168_v40 = vsel %vm420_vm1, 0.0, %v474_v37  ;;  %v470_v42 = vrot.slane %v2154_v35, 4  ;;  %v2175_v43 = vperm.slane %v445_v41, %v2138_v25  ;;  %v472_v47 = vrot.slane %v2161_v38, 4 }
 0x149   : > { %v2258_v37 = vperm.slane %v403_v28, 0 }
 0x14a   : > { %v2182_v44 = vsel %vm420_vm1, 0.0, %v470_v42  ;;  %v468_v45 = vrot.slane %v2175_v43, 4  ;;  %v2198_v48 = vsel %vm420_vm1, 0.0, %v472_v47  ;;  %v399_v47 = vrot.slane %v2208_v63, 7 }
 0x14c   : > { %v2188_v46 = vsel %vm420_vm1, 0.0, %v468_v45 }
 0x14e   : > { %512 = vrot.lane.b32.xlu0 %v2154_v35, %s1923_s17  ;;  %492 = vrot.lane.b32.xlu1 %v2161_v38, %s1924_s23 }
 0x150   : > { %522 = vrot.lane.b32.xlu2 %v2168_v40, %s1923_s17 }
 0x156   : > { %484 = vrot.lane.b32.xlu0 %v2175_v43, %s1924_s23  ;;  %498 = vrot.lane.b32.xlu1 %v2168_v40, %s1924_s23 }
 0x158   : > { %490 = vrot.lane.b32.xlu2 %v2182_v44, %s1924_s23 }
 0x15e   : > { %514 = vrot.lane.b32.xlu0 %v2182_v44, %s1923_s17  ;;  %486 = vrot.lane.b32.xlu1 %v2188_v46, %s1924_s23 }
 0x160   : > { %510 = vrot.lane.b32.xlu2 %v2188_v46, %s1923_s17 }
 0x168   : > { %494 = vrot.lane.b32.xlu2 %v2198_v48, %s1924_s23 }
 0x19a   : > { %v604_v50 = vpop.permute.xlu2 %603 }
 0x19b   : > { %v621_v53 = vrot.slane %v604_v50, 4 }
 0x1a2   : > { %v489_v6 = vpop.permute.xlu2 %488 }
 0x1a9   : > { %v600_v52 = vpop.permute.xlu0 %599 }
 0x1aa   : > { %v602_v54 = vpop.permute.xlu1 %601  ;;  %v623_v55 = vrot.slane %v600_v52, 4  ;;  %v622_v59 = vsel %vm420_vm1, %v621_v53, %v600_v52  ;;  %v523_v34 = vpop.permute.xlu2 %522 }
 0x1ab   : > { %v609_v56 = vrot.slane %v602_v54, 4  ;;  %v612_v57 = vsel %vm420_vm1, %v602_v54, %v611_v51  ;;  %v628_v2 = vperm.slane %v622_v59, %v2123_v14  ;;  %v559_v51 = vmul.f32 %v2256_v36, %v2154_v35 }
 0x1ac   : > { %v620_v58 = vperm.slane %v612_v57, %v2123_v14  ;;  %v624_v60 = vsel %vm420_vm1, %v604_v50, %v623_v55  ;;  %v408_v54 = vrot.slane %v2212_v3, 7 }
 0x1ad   : > { %v610_v61 = vsel %vm420_vm1, %v609_v56, %v598_v49  ;;  %v632_v62 = vperm.slane %v624_v60, %v2123_v14  ;;  %v633_v15 = vrot.slane %v628_v2, 4  ;;  %v2282_v56 = vperm.slane %v399_v47, 0 }
 0x1ae   : > { %v616_v0 = vperm.slane %v610_v61, %v2123_v14  ;;  %v647_v1 = vrot.slane %v620_v58, 4  ;;  %v2286_v35 = vperm.slane %v408_v54, 0  ;;  %v1662_v47 = vpack.i.bf16 %v2132_v22, %v2117_v11 }
 0x1af   : > { %v645_v29 = vrot.slane %v632_v62, 4  ;;  %v564_v61 = vmul.f32 %v2282_v56, %v2168_v40  ;;  %v393_v40 = vrot.slane %v2208_v63, 1 }
 0x1b0   : > { %v635_v4 = vrot.slane %v616_v0, 4  ;;  %v648_v5 = vsel %vm420_vm1, %v632_v62, %v647_v1  ;;  %v634_v20 = vsel %vm420_vm1, %v633_v15, %v616_v0  ;;  %v395_v62 = vrot.slane %v2208_v63, 3 }
 0x1b1   : > { %v2216_v8 = vperm.slane %v648_v5, %v2138_v25  ;;  %v2246_v33 = vperm.slane %v634_v20, %v2138_v25  ;;  %v646_v41 = vsel %vm420_vm1, %v645_v29, %v620_v58  ;;  %v402_v5 = vrot.slane %v2212_v3, 1 }
 0x1b2   : > { %v636_v12 = vsel %vm420_vm1, %v628_v2, %v635_v4  ;;  %v2267_v50 = vperm.slane %v646_v41, %v2138_v25  ;;  %v491_v57 = vpop.permute.xlu2 %490  ;;  %v404_v4 = vrot.slane %v2212_v3, 3  ;;  %v2310_v9 = vperm.slane %v395_v62, 0 }
 0x1b3   : > { %709 = vrot.lane.b32.xlu0 %v2216_v8, %s1923_s17  ;;  %685 = vrot.lane.b32.xlu2 %v2216_v8, %s1924_s23  ;;  %v2226_v16 = vperm.slane %v636_v12, %v2138_v25  ;;  %v663_v19 = vrot.slane %v2216_v8, 4  ;;  %v657_v39 = vrot.slane %v2246_v33, 4  ;;  %v2314_v13 = vperm.slane %v402_v5, 0 }
 0x1b4   : > { %v661_v58 = vrot.slane %v2267_v50, 4  ;;  %v2312_v12 = vperm.slane %v404_v4, 0  ;;  %v2317_v20 = vperm.slane %v393_v40, 0  ;;  %v560_v27 = vmul.f32 %v2310_v9, %v2182_v44 }
 0x1b5   : > { %677 = vrot.lane.b32.xlu1 %v2226_v16, %s1924_s23  ;;  %v2243_v31 = vsel %vm420_vm1, 0.0, %v663_v19  ;;  %v2273_v53 = vsel %vm420_vm1, 0.0, %v657_v39  ;;  %v659_v15 = vrot.slane %v2226_v16, 4  ;;  %v735_v11 = vmul.f32 %v2216_v8, %v2230_v17 }
 0x1b6   : > { %v2297_v2 = vsel %vm420_vm1, 0.0, %v661_v58  ;;  %v396_v58 = vrot.slane %v2208_v63, 4  ;;  %v731_v17 = vmul.f32 %v2226_v16, %v2256_v36  ;;  %v397_v36 = vrot.slane %v2208_v63, 5 }
 0x1b8   : > { %v521_v21 = vpop.permute.xlu1 %520  ;;  %v497_v23 = vpop.permute.xlu0 %496 }
 0x1b9   : > { %v539_v24 = vsel %vm532_vm2, %v497_v23, %v521_v21 }
 0x1ba   : > { %v587_v30 = vmul.f32 %v2232_v18, %v539_v24  ;;  %v511_v19 = vpop.permute.xlu2 %510 }
 0x1bb   : > { %687 = vrot.lane.b32.xlu0 %v2243_v31, %s1924_s23  ;;  %701 = vrot.lane.b32.xlu2 %v2226_v16, %s1923_s17 }
 0x1bc   : > { %v2252_v32 = vadd.f32 %v587_v30, %v563_v26  ;;  %v2326_v30 = vsel %vm420_vm1, 0.0, %v659_v15 }
 0x1bd   : > { %673 = vrot.lane.b32.xlu1 %v2246_v33, %s1924_s23 }
 0x1c0   : > { %v513_v42 = vpop.permute.xlu0 %512  ;;  %v2262_v45 = vpop.permute.xlu1 %492 }
 0x1c1   : > { %v535_v49 = vsel %vm532_vm2, %v489_v6, %v513_v42 }
 0x1c2   : > { %v583_v52 = vmul.f32 %v2258_v37, %v535_v49  ;;  %v495_v49 = vpop.permute.xlu2 %494 }
 0x1c3   : > { %675 = vrot.lane.b32.xlu0 %v2273_v53, %s1924_s23  ;;  %681 = vrot.lane.b32.xlu2 %v2267_v50, %s1924_s23 }
 0x1c4   : > { %v2280_v55 = vadd.f32 %v583_v52, %v559_v51 }
 0x1c5   : > { %697 = vrot.lane.b32.xlu1 %v2246_v33, %s1923_s17 }
 0x1c8   : > { %v2289_v59 = vpop.permute.xlu0 %484  ;;  %v499_v60 = vpop.permute.xlu1 %498 }
 0x1c9   : > { %v540_v0 = vsel %vm532_vm2, %v499_v60, %v523_v34  ;;  %v558_v34 = vmul.f32 %v2317_v20, %v2188_v46  ;;  %v1657_v46 = vpack.i.bf16 %v2115_v10, %v2109_v7 }
 0x1ca   : > { %v588_v1 = vmul.f32 %v2286_v35, %v540_v0  ;;  %v2360_v0 = vperm.slane %v396_v58, 0  ;;  %v736_v58 = vmul.f32 %v2243_v31, %v2282_v56 }
 0x1cb   : > { %683 = vrot.lane.b32.xlu0 %v2297_v2, %s1924_s23  ;;  %705 = vrot.lane.b32.xlu2 %v2267_v50, %s1923_s17 }
 0x1cc   : > { %v2306_v6 = vadd.f32 %v588_v1, %v564_v61  ;;  %v733_v40 = vmul.f32 %v2267_v50, %v2360_v0 }
 0x1cd   : > { %711 = vrot.lane.b32.xlu1 %v2243_v31, %s1923_s17 }
 0x1d0   : > { %v515_v21 = vpop.permute.xlu0 %514  ;;  %v487_v23 = vpop.permute.xlu1 %486 }
 0x1d1   : > { %v536_v24 = vsel %vm532_vm2, %v491_v57, %v515_v21  ;;  %v534_v26 = vsel %vm532_vm2, %v487_v23, %v511_v19  ;;  %v405_v57 = vrot.slane %v2212_v3, 4 }
 0x1d2   : > { %v584_v28 = vmul.f32 %v2312_v12, %v536_v24  ;;  %v582_v29 = vmul.f32 %v2314_v13, %v534_v26 }
 0x1d3   : > { %707 = vrot.lane.b32.xlu0 %v2297_v2, %s1923_s17  ;;  %703 = vrot.lane.b32.xlu2 %v2326_v30, %s1923_s17  ;;  %v2353_v60 = vperm.slane %v405_v57, 0 }
 0x1d4   : > { %v592_v39 = vadd.f32 %v584_v28, %v560_v27  ;;  %v590_v41 = vadd.f32 %v582_v29, %v558_v34  ;;  %v565_v27 = vperm.slane %v2212_v3, 0  ;;  %v541_v29 = vperm.slane %v2208_v63, 0 }
 0x1d5   : > { %679 = vrot.lane.b32.xlu1 %v2326_v30, %s1924_s23 }
 0x1d6   : > { %v827_v44 = vrot.slane %v592_v39, 4  ;;  %v729_v39 = vmul.f32 %v2246_v33, %v541_v29  ;;  %v546_v33 = vperm.slane %v397_v36, 0 }
 0x1d8   : > { %v2337_v42 = vsel %vm420_vm1, %v827_v44, %v590_v41 }
 0x1db   : > { %508 = vrot.lane.b32.xlu0 %v2175_v43, %s1923_s17  ;;  %518 = vrot.lane.b32.xlu2 %v2198_v48, %s1923_s17 }
 0x1dd   : > { %699 = vrot.lane.b32.xlu1 %v2273_v53, %s1923_s17 }
 0x1e3   : > { %1658 = vrot.lane.b32.xlu0 %v1657_v46, %s1925_s28 }
 0x1e5   : > { %516 = vrot.lane.b32.xlu1 %v2161_v38, %s1923_s17  ;;  %s1413_s17 = sshll.u32 %s1409_s9, 4  ;;  %s1414_s17 = int_to_ptr.hbm [resolvable:$true] %s1413_s17 }
 0x1e6   : > { %s1849_s23 = sshra.s32 %s1414_s17, 4  ;;  %s1850_s23 = int_to_ptr.hbm [resolvable:$true] %s1849_s23 }
 0x1e7   : > { %p1856_p12 = scmp.lt.s32.totalorder %s1850_s23, %s2590_s7 }
 0x1ed   : > { %1663 = vrot.lane.b32.xlu1 %v1662_v47, %s1925_s28  ;;  %s1851_s28 = scalar_lea.hbm %s1850_s23, 8 }
 0x1ee   : > { %p1852_p1 = scmp.ne.s32.totalorder %s1850_s23, %s1851_s28  ;;  %p1857_p7 = scmp.lt.s32.totalorder %s1855_s12, %s1851_s28 }
 0x1f0   : > { %p1853_p3 = pnand %p1852_p1, %p2056_p4  ;;  %p1858_p8 = por %p1857_p7, %p1856_p12 }
 0x1f2   : > { %p1854_p5 = pneg %p1853_p3 }
 0x1f4   : > { %p1859_p9 = pnand %p1858_p8, %p1854_p5 }
 0x20d   : > { %v686_v51 = vpop.permute.xlu2 %685 }
 0x215   : > { %v702_v52 = vpop.permute.xlu2 %701 }
 0x21d   : > { %v682_v54 = vpop.permute.xlu2 %681 }
 0x225   : > { %v710_v7 = vpop.permute.xlu0 %709  ;;  %v706_v10 = vpop.permute.xlu2 %705 }
 0x226   : > { %v727_v61 = vsel %vm532_vm2, %v686_v51, %v710_v7  ;;  %v725_v62 = vsel %vm532_vm2, %v682_v54, %v706_v10  ;;  %v406_v54 = vrot.slane %v2212_v3, 5 }
 0x227   : > { %v743_v22 = vmul.f32 %v727_v61, %v2232_v18  ;;  %v741_v1 = vmul.f32 %v725_v62, %v2353_v60  ;;  %v678_v4 = vpop.permute.xlu1 %677 }
 0x228   : > { %v723_v26 = vsel %vm532_vm2, %v678_v4, %v702_v52  ;;  %v570_v7 = vperm.slane %v406_v54, 0  ;;  %v561_v54 = vmul.f32 %v2360_v0, %v2161_v38 }
 0x229   : > { %v751_v5 = vadd.f32 %v743_v22, %v735_v11  ;;  %v749_v19 = vadd.f32 %v741_v1, %v733_v40  ;;  %v739_v8 = vmul.f32 %v723_v26, %v2258_v37  ;;  %v734_v11 = vmul.f32 %v2297_v2, %v546_v33 }
 0x22a   : > { %v732_v2 = vmul.f32 %v2326_v30, %v2310_v9 }
 0x22b   : > { %v889_v15 = vrot.slane %v751_v5, 4  ;;  %v747_v28 = vadd.f32 %v739_v8, %v731_v17 }
 0x22d   : > { %v890_v21 = vsel %vm420_vm1, %v889_v15, %v749_v19  ;;  %v688_v23 = vpop.permute.xlu0 %687  ;;  %v877_v41 = vrot.slane %v747_v28, 4  ;;  %v704_v51 = vpop.permute.xlu2 %703  ;;  %v557_v28 = vmul.f32 %v541_v29, %v2175_v43 }
 0x22e   : > { %v894_v4 = vperm.slane %v890_v21, %v2123_v14 }
 0x22f   : > { %v674_v24 = vpop.permute.xlu1 %673 }
 0x230   : > { %v915_v56 = vrot.slane %v894_v4, 4 }
 0x235   : > { %v676_v18 = vpop.permute.xlu0 %675  ;;  %v519_v3 = vpop.permute.xlu2 %518 }
 0x236   : > { %v538_v15 = vsel %vm532_vm2, %v495_v49, %v519_v3  ;;  %v562_v49 = vmul.f32 %v546_v33, %v2198_v48 }
 0x237   : > { %v698_v50 = vpop.permute.xlu1 %697  ;;  %v586_v8 = vmul.f32 %v570_v7, %v538_v15 }
 0x238   : > { %v721_v34 = vsel %vm532_vm2, %v674_v24, %v698_v50 }
 0x239   : > { %v737_v44 = vmul.f32 %v721_v34, %v565_v27  ;;  %v832_v34 = vperm.slane %v2337_v42, %v2123_v14 }
 0x23b   : > { %v745_v46 = vadd.f32 %v737_v44, %v729_v39  ;;  %v821_v39 = vrot.slane %v2280_v55, 4  ;;  %v845_v42 = vrot.slane %v832_v34, 4 }
 0x23d   : > { %v878_v47 = vsel %vm420_vm1, %v877_v41, %v745_v46  ;;  %v684_v37 = vpop.permute.xlu0 %683 }
 0x23e   : > { %v882_v43 = vperm.slane %v878_v47, %v2123_v14  ;;  %v833_v47 = vrot.slane %v2252_v32, 4 }
 0x23f   : > { %v712_v52 = vpop.permute.xlu1 %711 }
 0x240   : > { %v728_v16 = vsel %vm532_vm2, %v688_v23, %v712_v52 }
 0x241   : > { %v744_v57 = vmul.f32 %v728_v16, %v2286_v35 }
 0x243   : > { %v752_v10 = vadd.f32 %v744_v57, %v736_v58 }
 0x245   : > { %v708_v61 = vpop.permute.xlu0 %707  ;;  %v895_v5 = vrot.slane %v752_v10, 4 }
 0x246   : > { %v726_v62 = vsel %vm532_vm2, %v684_v37, %v708_v61  ;;  %v839_v37 = vrot.slane %v2306_v6, 4 }
 0x247   : > { %v742_v22 = vmul.f32 %v726_v62, %v570_v7  ;;  %v680_v1 = vpop.permute.xlu1 %679 }
 0x248   : > { %v724_v63 = vsel %vm532_vm2, %v680_v1, %v704_v51 }
 0x249   : > { %v750_v35 = vadd.f32 %v742_v22, %v734_v11  ;;  %v740_v31 = vmul.f32 %v724_v63, %v2312_v12 }
 0x24b   : > { %v896_v40 = vsel %vm420_vm1, %v895_v5, %v750_v35  ;;  %v748_v17 = vadd.f32 %v740_v31, %v732_v2 }
 0x24c   : > { %v900_v19 = vperm.slane %v896_v40, %v2123_v14 }
 0x24d   : > { %v509_v23 = vpop.permute.xlu0 %508  ;;  %v883_v29 = vrot.slane %v748_v17, 4 }
 0x24e   : > { %v913_v24 = vrot.slane %v900_v19, 4  ;;  %v533_v21 = vsel %vm532_vm2, %v2289_v59, %v509_v23  ;;  %v916_v26 = vsel %vm420_vm1, %v900_v19, %v915_v56  ;;  %v730_v59 = vmul.f32 %v2273_v53, %v2317_v20 }
 0x24f   : > { %v581_v12 = vmul.f32 %v565_v27, %v533_v21  ;;  %v700_v50 = vpop.permute.xlu1 %699  ;;  %v594_v27 = vadd.f32 %v586_v8, %v562_v49  ;;  %v924_v51 = vperm.slane %v916_v26, %v2138_v25  ;;  %v903_v20 = vrot.slane %v882_v43, 4 }
 0x250   : > { %v722_v9 = vsel %vm532_vm2, %v676_v18, %v700_v50  ;;  %v914_v30 = vsel %vm420_vm1, %v913_v24, %v894_v4 }
 0x251   : > { %v589_v44 = vadd.f32 %v581_v12, %v557_v28  ;;  %v738_v41 = vmul.f32 %v722_v9, %v2314_v13  ;;  %v840_v52 = vsel %vm420_vm1, %v839_v37, %v594_v27  ;;  %v920_v33 = vperm.slane %v914_v30, %v2138_v25 }
 0x252   : > { %v929_v10 = vrot.slane %v924_v51, 4  ;;  %v844_v62 = vperm.slane %v840_v52, %v2123_v14 }
 0x253   : > { %v822_v48 = vsel %vm420_vm1, %v821_v39, %v589_v44  ;;  %v746_v46 = vadd.f32 %v738_v41, %v730_v59  ;;  %v925_v63 = vrot.slane %v920_v33, 4 }
 0x254   : > { %v826_v18 = vperm.slane %v822_v48, %v2123_v14  ;;  %v857_v23 = vrot.slane %v844_v62, 4 }
 0x255   : > { %v884_v55 = vsel %vm420_vm1, %v883_v29, %v746_v46  ;;  %v1659_v16 = vpop.permute.xlu0 %1658 }
 0x256   : > { %v888_v53 = vperm.slane %v884_v55, %v2123_v14  ;;  %v846_v13 = vsel %vm420_vm1, %v845_v42, %v826_v18  ;;  %v847_v57 = vrot.slane %v826_v18, 4  ;;  %v1661_v11 = vunpack.i.h.bf16 %v1659_v16 }
 0x257   : > { %v517_v36 = vpop.permute.xlu1 %516  ;;  %v1660_v22 = vunpack.i.l.bf16 %v1659_v16  ;;  %v852_v35 = vperm.slane %v846_v13, %v2138_v25 }
 0x258   : > { %v537_v6 = vsel %vm532_vm2, %v2262_v45, %v517_v36  ;;  %v904_v58 = vsel %vm420_vm1, %v888_v53, %v903_v20  ;;  %v901_v61 = vrot.slane %v888_v53, 4  ;;  %v848_v38 = vsel %vm420_vm1, %v832_v34, %v847_v57 }
 0x259   : > { %v585_v7 = vmul.f32 %v2353_v60, %v537_v6  ;;  %v912_v32 = vperm.slane %v904_v58, %v2138_v25  ;;  %v779_v15 = vrot.slane %v1661_v11, 4  ;;  %v767_v19 = vrot.slane %v1660_v22, 4 }
 0x25a   : > { %v902_v1 = vsel %vm420_vm1, %v901_v61, %v882_v43  ;;  %v856_v24 = vperm.slane %v848_v38, %v2138_v25  ;;  %v871_v12 = vrot.slane %v852_v35, 4 }
 0x25b   : > { %v593_v0 = vadd.f32 %v585_v7, %v561_v54  ;;  %v930_v45 = vsel %vm420_vm1, %v929_v10, %v912_v32  ;;  %v931_v4 = vrot.slane %v912_v32, 4  ;;  %v908_v60 = vperm.slane %v902_v1, %v2138_v25 }
 0x25c   : > { %1543 = vmatpush.xpose.msk.msra.mxu3 %vm987_vm3, %v930_v45  ;;  %v875_v29 = vrot.slane %v856_v24, 4 }
 0x25d   : > { %v834_v3 = vsel %vm420_vm1, %v833_v47, %v593_v0  ;;  %v932_v5 = vsel %vm420_vm1, %v924_v51, %v931_v4  ;;  %v926_v31 = vsel %vm420_vm1, %v925_v63, %v908_v60  ;;  %v927_v56 = vrot.slane %v908_v60, 4 }
 0x25e   : > { %v838_v40 = vperm.slane %v834_v3, %v2123_v14  ;;  %1539 = vmatpush.xpose.msk.msra.mxu1 %vm987_vm3, %v926_v31 }
 0x25f   : > { %v1664_v2 = vpop.permute.xlu1 %1663  ;;  %v928_v17 = vsel %vm420_vm1, %v920_v33, %v927_v56 }
 0x260   : > { %v859_v21 = vrot.slane %v838_v40, 4  ;;  %v1666_v26 = vunpack.i.h.bf16 %v1664_v2  ;;  %v1665_v8 = vunpack.i.l.bf16 %v1664_v2  ;;  %1541 = vmatpush.xpose.msk.msra.mxu2 %vm987_vm3, %v928_v17  ;;  %v858_v28 = vsel %vm420_vm1, %v857_v23, %v838_v40 }
 0x261   : > { %v864_v59 = vperm.slane %v858_v28, %v2138_v25 }
 0x262   : > { %1545 = vmatpush.xpose.msk.msrb.mxu1 %vm987_vm3, %v932_v5  ;;  %v777_v50 = vrot.slane %v1666_v26, 4  ;;  %v780_v49 = vsel %vm420_vm1, %v1666_v26, %v779_v15  ;;  %v765_v34 = vrot.slane %v1665_v8, 4  ;;  %v768_v9 = vsel %vm420_vm1, %v1665_v8, %v767_v19 }
 0x263   : > { %v788_v30 = vperm.slane %v780_v49, %v2123_v14  ;;  %v776_v39 = vperm.slane %v768_v9, %v2123_v14  ;;  %v860_v44 = vsel %vm420_vm1, %v844_v62, %v859_v21  ;;  %v872_v37 = vsel %vm420_vm1, %v864_v59, %v871_v12 }
 0x264   : > { %v778_v41 = vsel %vm420_vm1, %v777_v50, %v1661_v11  ;;  %v766_v43 = vsel %vm420_vm1, %v765_v34, %v1660_v22  ;;  %v868_v27 = vperm.slane %v860_v44, %v2138_v25  ;;  %v869_v55 = vrot.slane %v864_v59, 4  ;;  %1542 = vmatmul.msk.f32.vlgmr.msra.gmra.mxu2 %vm987_vm3, %v872_v37 }
 0x265   : > { %v784_v48 = vperm.slane %v778_v41, %v2123_v14  ;;  %v801_v46 = vrot.slane %v788_v30, 4  ;;  %v772_v42 = vperm.slane %v766_v43, %v2123_v14  ;;  %v803_v18 = vrot.slane %v776_v39, 4 }
 0x266   : > { %v873_v51 = vrot.slane %v868_v27, 4  ;;  %v876_v53 = vsel %vm420_vm1, %v868_v27, %v875_v29  ;;  %v870_v54 = vsel %vm420_vm1, %v869_v55, %v852_v35  ;;  %v1092_v41 = vlaneseq }
 0x267   : > { %v789_v20 = vrot.slane %v784_v48, 4  ;;  %v791_v13 = vrot.slane %v772_v42, 4  ;;  %v802_v47 = vsel %vm420_vm1, %v801_v46, %v776_v39  ;;  %v804_v52 = vsel %vm420_vm1, %v788_v30, %v803_v18  ;;  %1540 = vmatmul.msk.f32.vlgmr.msra.gmra.mxu1 %vm987_vm3, %v870_v54 }
 0x268   : > { %v808_v16 = vperm.slane %v802_v47, %v2138_v25  ;;  %v812_v36 = vperm.slane %v804_v52, %v2138_v25  ;;  %v874_v57 = vsel %vm420_vm1, %v873_v51, %v856_v24  ;;  %v1093_v43 = vshrl.u32 %v1092_v41, 7 }
 0x269   : > { %v790_v6 = vsel %vm420_vm1, %v789_v20, %v772_v42  ;;  %v792_v58 = vsel %vm420_vm1, %v784_v48, %v791_v13  ;;  %1544 = vmatmul.msk.f32.vlgmr.msra.gmra.mxu3 %vm987_vm3, %v874_v57  ;;  %v1095_v27 = vand.u32 127, %v1092_v41 }
 0x26a   : > { %v796_v33 = vperm.slane %v790_v6, %v2138_v25  ;;  %v800_v7 = vperm.slane %v792_v58, %v2138_v25  ;;  %v817_v32 = vrot.slane %v808_v16, 4  ;;  %v819_v10 = vrot.slane %v812_v36, 4 }
 0x26b   : > { %vm1096_vm4 = vcmp.ge.s32.totalorder %v1093_v43, %v1095_v27 }
 0x26c   : > { %v815_v61 = vrot.slane %v800_v7, 4  ;;  %v820_v62 = vsel %vm420_vm1, 0.0, %v819_v10  ;;  %v813_v11 = vrot.slane %v796_v33, 4  ;;  %v944_v38 = vsel %vm420_vm1, %v819_v10, %v808_v16 }
 0x26d   : > { %v949_v22 = vrot.slane %v820_v62, 4  ;;  %v818_v45 = vsel %vm420_vm1, 0.0, %v817_v32  ;;  %v948_v4 = vperm.slane %v944_v38, %v2123_v14 }
 0x26e   : > { %v816_v0 = vsel %vm420_vm1, 0.0, %v815_v61  ;;  %v933_v1 = vsel %vm420_vm1, %v815_v61, %v796_v33  ;;  %v814_v5 = vsel %vm420_vm1, 0.0, %v813_v11 }
 0x26f   : > { %v937_v60 = vperm.slane %v933_v1, %v2123_v14  ;;  %v938_v63 = vrot.slane %v816_v0, 4  ;;  %v950_v3 = vsel %vm420_vm1, %v949_v22, %v818_v45  ;;  %v969_v40 = vrot.slane %v948_v4, 4  ;;  %1546 = vmatmul.msk.f32.vlgmr.msrb.gmra.mxu1 %vm987_vm3, %v876_v53 }
 0x270   : > { %v954_v35 = vperm.slane %v950_v3, %v2123_v14 }
 0x271   : > { %v939_v31 = vsel %vm420_vm1, %v938_v63, %v814_v5  ;;  %v957_v56 = vrot.slane %v937_v60, 4 }
 0x272   : > { %v943_v15 = vperm.slane %v939_v31, %v2123_v14  ;;  %v970_v19 = vsel %vm420_vm1, %v954_v35, %v969_v40  ;;  %v967_v2 = vrot.slane %v954_v35, 4 }
 0x273   : > { %v978_v23 = vperm.slane %v970_v19, %v2138_v25 }
 0x274   : > { %v958_v24 = vsel %vm420_vm1, %v943_v15, %v957_v56  ;;  %v955_v21 = vrot.slane %v943_v15, 4  ;;  %v968_v26 = vsel %vm420_vm1, %v967_v2, %v948_v4 }
 0x275   : > { %v966_v8 = vperm.slane %v958_v24, %v2138_v25  ;;  %v983_v17 = vrot.slane %v978_v23, 4  ;;  %v974_v28 = vperm.slane %v968_v26, %v2138_v25 }
 0x276   : > { %v956_v12 = vsel %vm420_vm1, %v955_v21, %v937_v60 }
 0x277   : > { %v984_v50 = vsel %vm420_vm1, %v983_v17, %v966_v8  ;;  %v985_v49 = vrot.slane %v966_v8, 4  ;;  %v962_v34 = vperm.slane %v956_v12, %v2138_v25  ;;  %v979_v9 = vrot.slane %v974_v28, 4 }
 0x278   : > { %1203 = vmatpush.msrb.mxu0 %v984_v50 }
 0x279   : > { %v980_v30 = vsel %vm420_vm1, %v979_v9, %v962_v34  ;;  %v986_v39 = vsel %vm420_vm1, %v978_v23, %v985_v49  ;;  %v981_v59 = vrot.slane %v962_v34, 4 }
 0x27a   : > { %1157 = vmatpush.msrb.mxu2 %v980_v30  ;;  %1226 = vmatpush.msra.mxu1 %v986_v39 }
 0x27b   : > { %v982_v44 = vsel %vm420_vm1, %v974_v28, %v981_v59 }
 0x27c   : > { %1180 = vmatpush.msrb.mxu3 %v982_v44 }
 0x2e4   : > { %v1011_v29 = vpop.f32.mrf.mxu1 }
 0x2e5   : > { %v1099_v48 = vsel %vm1096_vm4, %v1011_v29, -1e+30 }
 0x2e6   : > { %v1103_v46 = vsel %vm987_vm3, %v1099_v48, -inf }
 0x2e7   : > { %1104 = vmax.xlane.f32.xlu2 %v1103_v46  ;;  %v1037_v42 = vpop.f32.mrf.mxu2 }
 0x2e8   : > { %v1100_v18 = vsel %vm1096_vm4, %v1037_v42, -1e+30 }
 0x2e9   : > { %v1106_v37 = vsel %vm987_vm3, %v1100_v18, -inf }
 0x2ea   : > { %1107 = vmax.xlane.f32.xlu0 %v1106_v37 }
 0x2ec   : > { %v1063_v55 = vpop.f32.mrf.mxu3  ;;  %v1089_v53 = vpop.f32.mrf.mxu1 }
 0x2ed   : > { %v1101_v51 = vsel %vm1096_vm4, %v1063_v55, -1e+30  ;;  %v1102_v13 = vsel %vm1096_vm4, %v1089_v53, -1e+30 }
 0x2ee   : > { %v1109_v20 = vsel %vm987_vm3, %v1101_v51, -inf  ;;  %v1112_v47 = vsel %vm987_vm3, %v1102_v13, -inf }
 0x2ef   : > { %1110 = vmax.xlane.f32.xlu1 %v1109_v20  ;;  %1113 = vmax.xlane.f32.xlu2 %v1112_v47 }
 0x35a   : > { %v1105_v52 = vpop.xlane.xlu2 %1104 }
 0x35b   : > { %v1115_v16 = vsub.f32 %v1099_v48, %v1105_v52 }
 0x35d   : > { %v1119_v36 = vmul.f32 1.442695, %v1115_v16  ;;  %v1108_v54 = vpop.xlane.xlu0 %1107 }
 0x35e   : > { %v1116_v57 = vsub.f32 %v1100_v18, %v1108_v54 }
 0x35f   : > { %1669 = vpow2.f32 %v1119_v36 }
 0x360   : > { %v1121_v58 = vmul.f32 1.442695, %v1116_v57 }
 0x362   : > { %v1111_v6 = vpop.xlane.xlu1 %1110  ;;  %v1114_v7 = vpop.xlane.xlu2 %1113  ;;  %1671 = vpow2.f32 %v1121_v58 }
 0x363   : > { %v1117_v33 = vsub.f32 %v1101_v51, %v1111_v6  ;;  %v1118_v10 = vsub.f32 %v1102_v13, %v1114_v7 }
 0x365   : > { %v1123_v32 = vmul.f32 1.442695, %v1117_v33  ;;  %v1670_v61 = vpop.eup %1669  ;;  %v1125_v62 = vmul.f32 1.442695, %v1118_v10 }
 0x366   : > { %1547 = vmatmul.msk.f32.vlgmr.msrb.gmra.mxu2 %vm987_vm3, %v1670_v61  ;;  %v1127_v11 = vsel %vm987_vm3, %v1670_v61, 0.0 }
 0x367   : > { %1673 = vpow2.f32 %v1123_v32  ;;  %1128 = vadd.xlane.f32.xlu0 %v1127_v11 }
 0x368   : > { %1675 = vpow2.f32 %v1125_v62  ;;  %v1672_v22 = vpop.eup %1671 }
 0x369   : > { %1548 = vmatmul.msk.f32.vlgmr.msrb.gmra.mxu3 %vm987_vm3, %v1672_v22  ;;  %v1130_v4 = vsel %vm987_vm3, %v1672_v22, 0.0 }
 0x36d   : > { %v1674_v38 = vpop.eup %1673 }
 0x36e   : > { %1549 = vmatmul.msk.f32.vlgmr.msrb.gmra.mxu0 %vm987_vm3, %v1674_v38  ;;  %v1133_v0 = vsel %vm987_vm3, %v1674_v38, 0.0  ;;  %v1676_v45 = vpop.eup %1675 }
 0x36f   : > { %1134 = vadd.xlane.f32.xlu2 %v1133_v0  ;;  %1550 = vmatmul.msk.f32.vlgmr.msra.gmra.mxu1 %vm987_vm3, %v1676_v45  ;;  %v1136_v1 = vsel %vm987_vm3, %v1676_v45, 0.0 }
 0x370   : > { %1137 = vadd.xlane.f32.xlu1 %v1136_v1 }
 0x377   : > { %1131 = vadd.xlane.f32.xlu2 %v1130_v4 }
 0x3da   : > { %v1129_v60 = vpop.xlane.xlu0 %1128 }
 0x3db   : > { %1677 = vrcp.f32 %v1129_v60 }
 0x3e1   : > { %v1678_v5 = vpop.eup %1677 }
 0x3e2   : > { %v1135_v63 = vpop.xlane.xlu2 %1134 }
 0x3e3   : > { %v1138_v3 = vpop.xlane.xlu1 %1137  ;;  %1679 = vrcp.f32 %v1135_v63 }
 0x3e4   : > { %1681 = vrcp.f32 %v1138_v3 }
 0x3e9   : > { %v1680_v40 = vpop.eup %1679  ;;  %v1159_v31 = vpop.f32.mrf.mxu2 }
 0x3ea   : > { %v1132_v35 = vpop.xlane.xlu2 %1131  ;;  %v1235_v15 = vmul.f32 %v1678_v5, %v1159_v31  ;;  %v1682_v2 = vpop.eup %1681 }
 0x3eb   : > { %1683 = vrcp.f32 %v1132_v35  ;;  %v1205_v56 = vpop.f32.mrf.mxu0 }
 0x3ec   : > { %v1237_v19 = vmul.f32 %v1680_v40, %v1205_v56  ;;  %v1228_v23 = vpop.f32.mrf.mxu1  ;;  %v1241_v24 = vrot.slane %v1235_v15, 4  ;;  %v1182_v50 = vpop.f32.mrf.mxu3 }
 0x3ed   : > { %v1238_v26 = vmul.f32 %v1682_v2, %v1228_v23 }
 0x3ee   : > { %v1239_v21 = vrot.slane %v1237_v19, 4  ;;  %v1242_v17 = vsel %vm420_vm1, %v1237_v19, %v1241_v24 }
 0x3ef   : > { %v1251_v49 = vrot.slane %v1238_v26, 4  ;;  %v1250_v9 = vperm.slane %v1242_v17, %v2123_v14  ;;  %v1368_v17 = vld [vmem:[#allocation7 + $0x10] sm:$0xff] }
 0x3f0   : > { %v1240_v8 = vsel %vm420_vm1, %v1239_v21, %v1235_v15 }
 0x3f1   : > { %v1684_v28 = vpop.eup %1683  ;;  %v1246_v12 = vperm.slane %v1240_v8, %v2123_v14  ;;  %v1277_v43 = vrot.slane %v1250_v9, 4  ;;  %v1369_v8 = vld [vmem:[#allocation7 + $0x18] sm:$0xff] }
 0x3f2   : > { %v1236_v34 = vmul.f32 %v1684_v28, %v1182_v50  ;;  %1389 = vmatpush.msra.mxu2 %v1369_v8  ;;  %v1367_v28 = vld [vmem:[#allocation7 + $0x8] sm:$0xff] }
 0x3f3   : > { %v1265_v59 = vrot.slane %v1246_v12, 4 }
 0x3f4   : > { %v1252_v30 = vsel %vm420_vm1, %v1251_v49, %v1236_v34  ;;  %v1253_v39 = vrot.slane %v1236_v34, 4  ;;  %1390 = vmatpush.msra.mxu2 %v1368_v17 }
 0x3f5   : > { %v1258_v44 = vperm.slane %v1252_v30, %v2123_v14 }
 0x3f6   : > { %v1254_v41 = vsel %vm420_vm1, %v1238_v26, %v1253_v39  ;;  %1391 = vmatpush.msra.mxu2 %v1367_v28  ;;  %v1668_v39 = vld [vmem:[%s2587_s4] ss:$0 sm:$0xff] }
 0x3f7   : > { %v1262_v27 = vperm.slane %v1254_v41, %v2123_v14  ;;  %v1263_v29 = vrot.slane %v1258_v44, 4  ;;  %v1266_v48 = vsel %vm420_vm1, %v1258_v44, %v1265_v59 }
 0x3f8   : > { %v1274_v46 = vperm.slane %v1266_v48, %v2138_v25 }
 0x3f9   : > { %v1264_v42 = vsel %vm420_vm1, %v1263_v29, %v1246_v12  ;;  %v1275_v18 = vrot.slane %v1262_v27, 4  ;;  %v1278_v37 = vsel %vm420_vm1, %v1262_v27, %v1277_v43 }
 0x3fa   : > { %v1270_v55 = vperm.slane %v1264_v42, %v2138_v25  ;;  %v1286_v51 = vperm.slane %v1278_v37, %v2138_v25  ;;  %v1289_v53 = vrot.slane %v1274_v46, 4 }
 0x3fb   : > { %v1276_v20 = vsel %vm420_vm1, %v1275_v18, %v1250_v9 }
 0x3fc   : > { %v1282_v13 = vperm.slane %v1276_v20, %v2138_v25  ;;  %v1287_v47 = vrot.slane %v1270_v55, 4  ;;  %v1290_v52 = vsel %vm420_vm1, 0.0, %v1289_v53  ;;  %v1293_v16 = vrot.slane %v1286_v51, 4 }
 0x3fd   : > { %v1295_v36 = vsel %vm420_vm1, %v1289_v53, %v1270_v55  ;;  %v1300_v54 = vrot.slane %v1290_v52, 4 }
 0x3fe   : > { %v1294_v57 = vsel %vm420_vm1, 0.0, %v1293_v16  ;;  %v1288_v6 = vsel %vm420_vm1, 0.0, %v1287_v47  ;;  %v1291_v58 = vrot.slane %v1282_v13, 4  ;;  %v1299_v33 = vperm.slane %v1295_v36, %v2123_v14 }
 0x3ff   : > { %v1311_v7 = vrot.slane %v1294_v57, 4  ;;  %v1301_v32 = vsel %vm420_vm1, %v1300_v54, %v1288_v6  ;;  %v1306_v10 = vsel %vm420_vm1, %v1293_v16, %v1282_v13 }
 0x400   : > { %v1292_v61 = vsel %vm420_vm1, 0.0, %v1291_v58  ;;  %v1305_v62 = vperm.slane %v1301_v32, %v2123_v14  ;;  %v1310_v11 = vperm.slane %v1306_v10, %v2123_v14  ;;  %v1319_v22 = vrot.slane %v1299_v33, 4 }
 0x401   : > { %v1312_v38 = vsel %vm420_vm1, %v1311_v7, %v1292_v61 }
 0x402   : > { %v1316_v0 = vperm.slane %v1312_v38, %v2123_v14  ;;  %v1320_v45 = vsel %vm420_vm1, %v1305_v62, %v1319_v22  ;;  %v1331_v1 = vrot.slane %v1310_v11, 4  ;;  %v1317_v4 = vrot.slane %v1305_v62, 4 }
 0x403   : > { %v1328_v60 = vperm.slane %v1320_v45, %v2138_v25 }
 0x404   : > { %v1332_v63 = vsel %vm420_vm1, %v1316_v0, %v1331_v1  ;;  %v1318_v3 = vsel %vm420_vm1, %v1317_v4, %v1299_v33  ;;  %v1329_v5 = vrot.slane %v1316_v0, 4 }
 0x405   : > { %v1340_v35 = vperm.slane %v1332_v63, %v2138_v25  ;;  %v1347_v40 = vrot.slane %v1328_v60, 4  ;;  %v1324_v31 = vperm.slane %v1318_v3, %v2138_v25 }
 0x406   : > { %v1330_v56 = vsel %vm420_vm1, %v1329_v5, %v1310_v11 }
 0x407   : > { %v1348_v14 = vsel %vm420_vm1, %v1340_v35, %v1347_v40  ;;  %v1345_v15 = vrot.slane %v1340_v35, 4  ;;  %v1336_v19 = vperm.slane %v1330_v56, %v2138_v25  ;;  %v1343_v2 = vrot.slane %v1324_v31, 4  ;;  %v1366_v25 = vld [vmem:[#allocation7] sm:$0xff] }
 0x408   : > { %1358 = vrot.lane.b32.xlu2 %v1348_v14, %s1926_s29  ;;  %1392 = vmatpush.msra.mxu2 %v1366_v25 }
 0x409   : > { %v1346_v23 = vsel %vm420_vm1, %v1345_v15, %v1328_v60  ;;  %v1341_v24 = vrot.slane %v1336_v19, 4  ;;  %v1344_v21 = vsel %vm420_vm1, %v1336_v19, %v1343_v2 }
 0x40a   : > { %1354 = vrot.lane.b32.xlu1 %v1346_v23, %s1927_s10  ;;  %1350 = vrot.lane.b32.xlu0 %v1344_v21, %s1928_s19 }
 0x40b   : > { %v1342_v26 = vsel %vm420_vm1, %v1341_v24, %v1324_v31 }
 0x462   : > { %v1359_v34 = vpop.permute.xlu2 %1358 }
 0x47c   : > { %v1355_v12 = vpop.permute.xlu1 %1354  ;;  %v1351_v50 = vpop.permute.xlu0 %1350 }
 0x47d   : > { %v1361_v49 = vsel %vm987_vm3, %v1342_v26, %v1351_v50 }
 0x47e   : > { %v1363_v9 = vsel %vm1362_vm5, %v1361_v49, %v1355_v12 }
 0x47f   : > { %v1365_v30 = vsel %vm1364_vm6, %v1363_v9, %v1359_v34 }
 0x480   : > { %1551 = vmatmul.msk.f32.vlgmr.msra.gmra.mxu2 %vm367_vm0, %v1365_v30 }
 0x503   : > { %v1394_v59 = vpop.f32.mrf.mxu2 }
 0x504   : > { %v1395_v44 = vadd.f32 %v1668_v39, %v1394_v59 }
 0x506   : > { %1397 = vst.msk [vmem:[%s357_s16] sm:$0xff] %vm367_vm0, %v1395_v44 }
 0x507   : > { %1862 = shalt.err (!%p1859_p9)
}
 0x508   : > { %1574 = dma.vmem_to_hbm [thread:$0]  (%p2056_p4), %s1412_s13, 128, %s1414_s17, %s1399_s8  }
 0x509 PF: > { %s1425_s20 = sand.u32 1, %s1897_s24   ;;  %p2602_p10 = scmp.ge.s32.totalorder %s1909_s27, 2 }
 0x50a   : > { %s1426_s1 = scalar_lea.sflag [#allocation4], %s1425_s20 }
 0x50b   : > { %p1594_p13 = pnand %p2602_p10, %p2060_p6 }
 0x50d   : > { %p1595_p11 = pneg %p1594_p13 }
 0x50f   : > { %1892 = dma.done.wait (%p1595_p11), %s1426_s1, 128  }
 0x510   : > { %1894 = vsyncadd (%p1595_p11), %s1426_s1, 4294967168  ;;  %p22_p0 = scmp.ge.s32.totalorder %s2030_s14, 4   ;;  %s2603_s24 = smov %s1901_s25 }
 0x511   : > { %s2604_s25 = smov %s1905_s26  ;;  %s2605_s26 = smov %s2041_s18 }
 0x512   : > { %s2606_s27 = smov %s2030_s14  ;;  %24 = sbr.rel (!%p22_p0) target bundleno = 10 (0xa), region = 109 }
 0x517   :  { %1432 = vsyncpa [#allocation3], 1 }
 0x518   :  { %1434 = vsyncpa [#allocation3 + $0x1], 1 }
 0x519   :  { %1435 = vsyncpa [#allocation6], 1 }
 0x51a   :  { %1436 = vsyncpa [#allocation9], 1 }
 0x51b   :  { %1437 = vsyncpa [#allocation4], 1 }
 0x51c   :  { %1439 = vsyncpa [#allocation4 + $0x1], 1 }

</bundles_post_ra>
